<compile_context>
chip_gen: v7x
topology: tpu7x:2x2x1
jax: 0.10.0
libtpu: 0.0.40
codegen_flags: <defaults>
</compile_context>

<pallas_src>
import functools

import jax
import jax.numpy as jnp
from jax.experimental import pallas as pl
from jax.experimental.pallas import tpu as pltpu

LANES = 128     # lane width; hidden/output feature dims are zero-padded to this
H1, H2 = 32, 16  # hidden sizes from the PyTorch module


def _align8(n):
    return -(-n // 8) * 8


def _offsets(S, A):
    """Row offsets of each parameter block inside the packed (rows, 128) buffer."""
    r_w1s = 0
    r_w1a = _align8(r_w1s + S)
    r_b1 = _align8(r_w1a + A)
    r_w2 = _align8(r_b1 + 1)
    r_b2 = _align8(r_w2 + LANES)
    r_w3 = _align8(r_b2 + 1)
    r_b3 = _align8(r_w3 + LANES)
    n_rows = _align8(r_b3 + 1)
    return r_w1s, r_w1a, r_b1, r_w2, r_b2, r_w3, r_b3, n_rows


def _mlp_kernel(s_ref, a_ref, p_ref, o_ref, *, S, A):
    r_w1s, r_w1a, r_b1, r_w2, r_b2, r_w3, r_b3, _ = _offsets(S, A)
    bf16, f32 = jnp.bfloat16, jnp.float32

    xs = s_ref[...].astype(bf16)                      # (Bm, S)
    xa = a_ref[...].astype(bf16)                      # (Bm, A)

    # Static slices of the single packed parameter buffer (zero-padded to 128 lanes).
    w1s = p_ref[r_w1s:r_w1s + S, :].astype(bf16)      # (S, 128)
    w1a = p_ref[r_w1a:r_w1a + A, :].astype(bf16)      # (A, 128)
    b1 = p_ref[r_b1:r_b1 + 1, :]                      # (1, 128) f32
    w2 = p_ref[r_w2:r_w2 + LANES, :].astype(bf16)     # (128, 128), rows >= H1 are zero
    b2 = p_ref[r_b2:r_b2 + 1, :]
    w3 = p_ref[r_w3:r_w3 + LANES, :].astype(bf16)     # (128, 128), rows >= H2 are zero
    b3 = p_ref[r_b3:r_b3 + 1, :]

    # Layer 1: concat fused as two MXU dots; bias/ReLU in f32 on the VPU.
    h1 = (jnp.dot(xs, w1s, preferred_element_type=f32)
          + jnp.dot(xa, w1a, preferred_element_type=f32)
          + b1)
    h1 = jnp.maximum(h1, 0.0)                         # padded lanes stay exactly 0
    h2 = jnp.maximum(
        jnp.dot(h1.astype(bf16), w2, preferred_element_type=f32) + b2, 0.0)
    out = jnp.dot(h2.astype(bf16), w3, preferred_element_type=f32) + b3

    o_ref[...] = out.astype(o_ref.dtype)              # lane-dense (Bm, 128) store


def pack_params(params, state_size, action_size):
    """Pack (w1, b1, w2, b2, w3, b3) into one zero-padded (rows, 128) f32 buffer."""
    w1, b1, w2, b2, w3, b3 = params
    S, A = state_size, action_size
    r_w1s, r_w1a, r_b1, r_w2, r_b2, r_w3, r_b3, n_rows = _offsets(S, A)
    buf = jnp.zeros((n_rows, LANES), jnp.float32)
    buf = buf.at[r_w1s:r_w1s + S, :H1].set(w1[:S].astype(jnp.float32))   # W1 (state rows)
    buf = buf.at[r_w1a:r_w1a + A, :H1].set(w1[S:].astype(jnp.float32))   # W1 (action rows)
    buf = buf.at[r_b1, :H1].set(b1.astype(jnp.float32))
    buf = buf.at[r_w2:r_w2 + H1, :H2].set(w2.astype(jnp.float32))
    buf = buf.at[r_b2, :H2].set(b2.astype(jnp.float32))
    buf = buf.at[r_w3:r_w3 + H2, :S].set(w3.astype(jnp.float32))
    buf = buf.at[r_b3, :S].set(b3.astype(jnp.float32))
    return buf


def state_predictor_forward(state, action, packed_params, *,
                            state_size, action_size, block_b=128):
    """state: (S,) or (B, S); action: (A,) or (B, A) -> (S,) or (B, S)."""
    single = state.ndim == 1
    if single:
        state, action = state[None, :], action[None, :]
    B = state.shape[0]
    Bp = -(-B // block_b) * block_b
    state = state.astype(jnp.float32)
    action = action.astype(jnp.float32)
    if Bp != B:
        state = jnp.pad(state, ((0, Bp - B), (0, 0)))
        action = jnp.pad(action, ((0, Bp - B), (0, 0)))

    kernel = functools.partial(_mlp_kernel, S=state_size, A=action_size)
    flops = 2 * Bp * ((state_size + action_size) * H1 + H1 * H2 + H2 * state_size)
    bytes_accessed = 4 * (Bp * (state_size + action_size)
                          + packed_params.size + Bp * LANES)

    out = pl.pallas_call(
        kernel,
        out_shape=jax.ShapeDtypeStruct((Bp, LANES), jnp.float32),
        grid_spec=pltpu.PrefetchScalarGridSpec(
            num_scalar_prefetch=0,
            grid=(Bp // block_b,),
            in_specs=[
                pl.BlockSpec((block_b, state_size), lambda b: (b, 0)),
                pl.BlockSpec((block_b, action_size), lambda b: (b, 0)),
                # Full packed-parameter buffer, resident across the whole grid.
                pl.BlockSpec(packed_params.shape, lambda b: (0, 0)),
            ],
            out_specs=pl.BlockSpec((block_b, LANES), lambda b: (b, 0)),
        ),
        compiler_params=pltpu.CompilerParams(
            dimension_semantics=("parallel",)),
        cost_estimate=pl.CostEstimate(
            flops=flops, transcendentals=0, bytes_accessed=bytes_accessed),
    )(state, action, packed_params)

    out = out[:, :state_size]
    return out[0] if single else out[:B]


def init_params(key, state_size, action_size):
    """Mirror the PyTorch init: fanin_init for l1/l2 weights, U(-3e-3, 3e-3) head weight,
    nn.Linear default U(-1/sqrt(fan_in), ...) biases. Weights stored as (in, out)."""
    # TODO(synk): verify the original utils' fanin_init / whether head bias is also clamped.
    sizes = [state_size + action_size, H1, H2, state_size]
    keys = jax.random.split(key, 6)

    def unif(k, shape, bound):
        return jax.random.uniform(k, shape, jnp.float32, -bound, bound)

    f1 = 1.0 / sizes[0] ** 0.5
    w1 = unif(keys[0], (sizes[0], sizes[1]), f1)
    b1 = unif(keys[1], (sizes[1],), f1)
    f2 = 1.0 / sizes[1] ** 0.5
    w2 = unif(keys[2], (sizes[1], sizes[2]), f2)
    b2 = unif(keys[3], (sizes[2],), f2)
    f3 = 1.0 / sizes[2] ** 0.5
    w3 = unif(keys[4], (sizes[2], sizes[3]), 3 * 0.001)
    b3 = unif(keys[5], (sizes[3],), f3)
    return (w1, b1, w2, b2, w3, b3)


def reference_forward(state, action, params):
    """Pure-JAX f32 reference (matches PyTorch semantics)."""
    w1, b1, w2, b2, w3, b3 = params
    x = jnp.concatenate([state, action], axis=-1).astype(jnp.float32)
    h1 = jnp.maximum(x @ w1 + b1, 0.0)
    h2 = jnp.maximum(h1 @ w2 + b2, 0.0)
    return h2 @ w3 + b3


def reference_forward_bf16(state, action, params):
    """Reference with the same bf16-MXU / f32-accumulate recipe as the kernel."""
    w1, b1, w2, b2, w3, b3 = params
    bf16, f32 = jnp.bfloat16, jnp.float32
    x = jnp.concatenate([state, action], axis=-1).astype(f32)
    h1 = jnp.maximum(
        jnp.dot(x.astype(bf16), w1.astype(bf16), preferred_element_type=f32) + b1, 0.0)
    h2 = jnp.maximum(
        jnp.dot(h1.astype(bf16), w2.astype(bf16), preferred_element_type=f32) + b2, 0.0)
    return jnp.dot(h2.astype(bf16), w3.astype(bf16), preferred_element_type=f32) + b3


if __name__ == "__main__":
    state_size, action_size = 4, 4

    key = jax.random.PRNGKey(0)
    k_params, k_state, k_action = jax.random.split(key, 3)

    params = init_params(k_params, state_size, action_size)
    packed = pack_params(params, state_size, action_size)   # pack once, reuse every call

    fwd = jax.jit(functools.partial(
        state_predictor_forward,
        state_size=state_size, action_size=action_size, block_b=128))

    # Batched path: B = 256 rows, batch tile = 128 -> grid = (2,).
    B = 256
    states = jax.random.normal(k_state, (B, state_size), jnp.float32)
    actions = jax.random.normal(k_action, (B, action_size), jnp.float32)

    out = jax.block_until_ready(fwd(states, actions, packed))
    assert out.shape == (B, state_size)

    ref_bf16 = reference_forward_bf16(states, actions, params)
    ref_f32 = reference_forward(states, actions, params)
    assert jnp.allclose(out, ref_bf16, atol=1e-4, rtol=1e-4), "mismatch vs bf16 reference"
    assert jnp.allclose(out, ref_f32, atol=2e-2, rtol=2e-2), "mismatch vs f32 reference"

    # Single-sample path (exactly the PyTorch module's 1-D forward signature).
    out1 = jax.block_until_ready(fwd(states[0], actions[0], packed))
    assert out1.shape == (state_size,)
    assert jnp.allclose(out1, ref_f32[0], atol=2e-2, rtol=2e-2)

    print("KERNEL_OK")
</pallas_src>

<mosaic_0001>
module attributes {stable_mosaic.version = 11 : i64} {
  func.func @_mlp_kernel(%arg0: i32, %arg1: memref<128x4xf32, #tpu.memory_space<vmem>>, %arg2: memref<128x4xf32, #tpu.memory_space<vmem>>, %arg3: memref<296x128xf32, #tpu.memory_space<vmem>>, %arg4: memref<128x128xf32, #tpu.memory_space<vmem>>) attributes {dimension_semantics = [#tpu.dimension_semantics<parallel>], iteration_bounds = array<i64: 2>, scalar_prefetch = 0 : i64, scratch_operands = 0 : i64, tpu.core_type = #tpu.core_type<tc>, window_params = [{transform_indices = @transform_0, window_bounds = array<i64: 128, 4>}, {transform_indices = @transform_1, window_bounds = array<i64: 128, 4>}, {pipeline_mode = #tpu.pipeline_mode<synchronous>, transform_indices = @transform_2, window_bounds = array<i64: 296, 128>}, {transform_indices = @transform_3, window_bounds = array<i64: 128, 128>}]} {
    %c0 = arith.constant 0 : index
    %c0_0 = arith.constant 0 : index
    %0 = vector.load %arg1[%c0, %c0_0] : memref<128x4xf32, #tpu.memory_space<vmem>>, vector<128x4xf32>
    %1 = arith.truncf %0 : vector<128x4xf32> to vector<128x4xbf16>
    %c0_1 = arith.constant 0 : index
    %c0_2 = arith.constant 0 : index
    %2 = vector.load %arg2[%c0_1, %c0_2] : memref<128x4xf32, #tpu.memory_space<vmem>>, vector<128x4xf32>
    %3 = arith.truncf %2 : vector<128x4xf32> to vector<128x4xbf16>
    %c0_3 = arith.constant 0 : index
    %c0_4 = arith.constant 0 : index
    %4 = vector.load %arg3[%c0_3, %c0_4] : memref<296x128xf32, #tpu.memory_space<vmem>>, vector<4x128xf32>
    %5 = arith.truncf %4 : vector<4x128xf32> to vector<4x128xbf16>
    %c8 = arith.constant 8 : index
    %c0_5 = arith.constant 0 : index
    %6 = vector.load %arg3[%c8, %c0_5] : memref<296x128xf32, #tpu.memory_space<vmem>>, vector<4x128xf32>
    %7 = arith.truncf %6 : vector<4x128xf32> to vector<4x128xbf16>
    %c16 = arith.constant 16 : index
    %c0_6 = arith.constant 0 : index
    %8 = vector.load %arg3[%c16, %c0_6] : memref<296x128xf32, #tpu.memory_space<vmem>>, vector<1x128xf32>
    %c24 = arith.constant 24 : index
    %c0_7 = arith.constant 0 : index
    %9 = vector.load %arg3[%c24, %c0_7] : memref<296x128xf32, #tpu.memory_space<vmem>>, vector<128x128xf32>
    %10 = arith.truncf %9 : vector<128x128xf32> to vector<128x128xbf16>
    %c152 = arith.constant 152 : index
    %c0_8 = arith.constant 0 : index
    %11 = vector.load %arg3[%c152, %c0_8] : memref<296x128xf32, #tpu.memory_space<vmem>>, vector<1x128xf32>
    %c160 = arith.constant 160 : index
    %c0_9 = arith.constant 0 : index
    %12 = vector.load %arg3[%c160, %c0_9] : memref<296x128xf32, #tpu.memory_space<vmem>>, vector<128x128xf32>
    %13 = arith.truncf %12 : vector<128x128xf32> to vector<128x128xbf16>
    %c288 = arith.constant 288 : index
    %c0_10 = arith.constant 0 : index
    %14 = vector.load %arg3[%c288, %c0_10] : memref<296x128xf32, #tpu.memory_space<vmem>>, vector<1x128xf32>
    %cst = arith.constant dense<0.000000e+00> : vector<128x128xf32>
    %15 = tpu.matmul %1, %5, %cst {dimension_numbers = #tpu.dot_dimension_numbers<[1], [0], [0], [1], [0, 0, 1, 1], [], []>} : vector<128x4xbf16>, vector<4x128xbf16>, vector<128x128xf32> -> vector<128x128xf32>
    %cst_11 = arith.constant dense<0.000000e+00> : vector<128x128xf32>
    %16 = tpu.matmul %3, %7, %cst_11 {dimension_numbers = #tpu.dot_dimension_numbers<[1], [0], [0], [1], [0, 0, 1, 1], [], []>} : vector<128x4xbf16>, vector<4x128xbf16>, vector<128x128xf32> -> vector<128x128xf32>
    %17 = arith.addf %15, %16 : vector<128x128xf32>
    %18 = vector.broadcast %8 : vector<1x128xf32> to vector<128x128xf32>
    %19 = arith.addf %17, %18 : vector<128x128xf32>
    %cst_12 = arith.constant 0.000000e+00 : f32
    %20 = vector.broadcast %cst_12 : f32 to vector<128x128xf32>
    %21 = arith.maximumf %19, %20 : vector<128x128xf32>
    %22 = arith.truncf %21 : vector<128x128xf32> to vector<128x128xbf16>
    %cst_13 = arith.constant dense<0.000000e+00> : vector<128x128xf32>
    %23 = tpu.matmul %22, %10, %cst_13 {dimension_numbers = #tpu.dot_dimension_numbers<[1], [0], [0], [1], [0, 0, 1, 1], [], []>} : vector<128x128xbf16>, vector<128x128xbf16>, vector<128x128xf32> -> vector<128x128xf32>
    %24 = vector.broadcast %11 : vector<1x128xf32> to vector<128x128xf32>
    %25 = arith.addf %23, %24 : vector<128x128xf32>
    %cst_14 = arith.constant 0.000000e+00 : f32
    %26 = vector.broadcast %cst_14 : f32 to vector<128x128xf32>
    %27 = arith.maximumf %25, %26 : vector<128x128xf32>
    %28 = arith.truncf %27 : vector<128x128xf32> to vector<128x128xbf16>
    %cst_15 = arith.constant dense<0.000000e+00> : vector<128x128xf32>
    %29 = tpu.matmul %28, %13, %cst_15 {dimension_numbers = #tpu.dot_dimension_numbers<[1], [0], [0], [1], [0, 0, 1, 1], [], []>} : vector<128x128xbf16>, vector<128x128xbf16>, vector<128x128xf32> -> vector<128x128xf32>
    %30 = vector.broadcast %14 : vector<1x128xf32> to vector<128x128xf32>
    %31 = arith.addf %29, %30 : vector<128x128xf32>
    %c0_16 = arith.constant 0 : index
    %c0_17 = arith.constant 0 : index
    %32 = vector.load %arg4[%c0_16, %c0_17] : memref<128x128xf32, #tpu.memory_space<vmem>>, vector<128x128xf32>
    tpu.vector_store %arg4[%c0_16, %c0_17], %31 {strides = array<i32>} : memref<128x128xf32, #tpu.memory_space<vmem>>, vector<128x128xf32>,
    return
  }
  func.func @transform_0(%arg0: i32) -> (i32, i32) {
    %c0_i32 = arith.constant 0 : i32
    %c0_i32_0 = arith.constant 0 : i32
    return %arg0, %c0_i32 : i32, i32
  }
  func.func @transform_1(%arg0: i32) -> (i32, i32) {
    %c0_i32 = arith.constant 0 : i32
    %c0_i32_0 = arith.constant 0 : i32
    return %arg0, %c0_i32 : i32, i32
  }
  func.func @transform_2(%arg0: i32) -> (i32, i32) {
    %c0_i32 = arith.constant 0 : i32
    %c0_i32_0 = arith.constant 0 : i32
    %c0_i32_1 = arith.constant 0 : i32
    return %c0_i32, %c0_i32_0 : i32, i32
  }
  func.func @transform_3(%arg0: i32) -> (i32, i32) {
    %c0_i32 = arith.constant 0 : i32
    %c0_i32_0 = arith.constant 0 : i32
    return %arg0, %c0_i32 : i32, i32
  }
}

</mosaic_0001>

<bundles_post_ra>
// kernel: state_predictor_forward.1
= control target key start
LH: loop header
LB: loop body
LE: loop exit
PB: predicated region body
PF: predicated region fallthrough
CT: control target
= control target key end

     0   :  { %s1156_s12 = smov 0   ;;  %s1408_s0 = inlined_call_operand.vmem [shape: f32[256,4], index: 0, kind: input, shape index: {}]   ;;  %s1409_s1 = inlined_call_operand.vmem [shape: f32[256,4], index: 1, kind: input, shape index: {}]   ;;  %s1410_s2 = inlined_call_operand.vmem [shape: f32[296,128], index: 2, kind: input, shape index: {}]   ;;  %s1411_s3 = inlined_call_operand.vmem [shape: f32[256,128], index: 3, kind: output, shape index: {}]  }
   0x1 LB: > { %s904_s13 = sadd.s32 4294967295, %s1134_s12   ;;  %p908_p0 = scmp.ge.s32.totalorder %s1134_s12, 1  ;;  %s1134_s12 = sphi %s1156_s12, %s13_s12  }
   0x2   : > { %p149_p1 = scmp.lt.s32.totalorder %s1134_s12, 3 }
   0x4   : > { %p150_p2 = pnand %p908_p0, %p149_p1 }
   0x5   : > { %v247_v0 = vld [vmem:[%s1410_s2 + $0x8] sm:$0xf] (!%p150_p2)  ;;  %vm325_vm0 = vcmask (!%p150_p2), 1041408   ;;  %s909_s16 = sshll.u32 (!%p150_p2), %s904_s13, 4  ;;  %v250_v1 = vld [vmem:[%s1410_s2 + $0x18] sm:$0xff] (!%p150_p2)  ;;  %v251_v4 = vld [vmem:[%s1410_s2 + $0x20] sm:$0xff] (!%p150_p2) }
   0x6   : > { %153 = sbr.rel (%p150_p2) target bundleno = 738 (0x2e2), region = 32  ;;  %v248_v2 = vpack.c.bf16 (!%p150_p2), %v247_v0, %v247_v0  ;;  %p179_p3 = scmp.lt.s32.totalorder (!%p150_p2), %s909_s16, 31  ;;  %v245_v3 = vld [vmem:[%s1410_s2] sm:$0xf] (!%p150_p2)  ;;  %v252_v5 = vld [vmem:[%s1410_s2 + $0x28] sm:$0xff] (!%p150_p2)  ;;  %v266_v7 = vpack.c.bf16 (!%p150_p2), %v251_v4, %v250_v1  ;;  %v253_v8 = vld [vmem:[%s1410_s2 + $0x30] sm:$0xff] (!%p150_p2) }
   0x7   : > { %v246_v6 = vpack.c.bf16 (!%p150_p2), %v245_v3, %v245_v3  ;;  %v267_v10 = vpack.c.bf16 (!%p150_p2), %v253_v8, %v252_v5  ;;  %v254_v11 = vld [vmem:[%s1410_s2 + $0x38] sm:$0xff] (!%p150_p2)  ;;  %v255_v12 = vld [vmem:[%s1410_s2 + $0x40] sm:$0xff] (!%p150_p2)  ;;  %v256_v14 = vld [vmem:[%s1410_s2 + $0x48] sm:$0xff] (!%p150_p2)  ;;  %vm300_vm1 = vcmask (!%p150_p2), 31744  }
   0x8   : > { %1118 = vmatprep.subr.msk.bf16.mxu0 (!%p150_p2), %vm325_vm0, %v248_v2  ;;  %v327_v9 = vsel (!%p150_p2), %vm325_vm0, %v248_v2, 0  ;;  %1022 = vmatprep.subr.bf16.mxu1 (!%p150_p2), %v266_v7  ;;  %v268_v13 = vpack.c.bf16 (!%p150_p2), %v255_v12, %v254_v11  ;;  %v257_v15 = vld [vmem:[%s1410_s2 + $0x50] sm:$0xff] (!%p150_p2)  ;;  %v258_v27 = vld [vmem:[%s1410_s2 + $0x58] sm:$0xff] (!%p150_p2)  ;;  %v259_v28 = vld [vmem:[%s1410_s2 + $0x60] sm:$0xff] (!%p150_p2) }
   0x9   : > { %987 = vmatpush3.bf16.msra.mxu0 (!%p150_p2), %v327_v9  ;;  %1023 = vmatpush3.bf16.msra.mxu1 (!%p150_p2), %v266_v7  ;;  %v451_v24 = vsel (!%p150_p2), %vm325_vm0, %v246_v6, 0  ;;  %v269_v26 = vpack.c.bf16 (!%p150_p2), %v257_v15, %v256_v14  ;;  %v270_v33 = vpack.c.bf16 (!%p150_p2), %v259_v28, %v258_v27  ;;  %v260_v35 = vld [vmem:[%s1410_s2 + $0x68] sm:$0xff] (!%p150_p2)  ;;  %v261_v36 = vld [vmem:[%s1410_s2 + $0x70] sm:$0xff] (!%p150_p2)  ;;  %v262_v8 = vld [vmem:[%s1410_s2 + $0x78] sm:$0xff] (!%p150_p2) }
   0xa   : > { %1119 = vmatprep.subr.msk.bf16.mxu0 (!%p150_p2), %vm325_vm0, %v246_v6  ;;  %1024 = vmatprep.subr.bf16.mxu1 (!%p150_p2), %v267_v10  ;;  %v271_v38 = vpack.c.bf16 (!%p150_p2), %v261_v36, %v260_v35  ;;  %v263_v9 = vld [vmem:[%s1410_s2 + $0x80] sm:$0xff] (!%p150_p2)  ;;  %v264_v11 = vld [vmem:[%s1410_s2 + $0x88] sm:$0xff] (!%p150_p2)  ;;  %v265_v12 = vld [vmem:[%s1410_s2 + $0x90] sm:$0xff] (!%p150_p2) }
   0xb   : > { %v275_v14 = vld [vmem:[%s1410_s2 + $0xa0] sm:$0xff] (!%p150_p2)  ;;  %v276_v15 = vld [vmem:[%s1410_s2 + $0xa8] sm:$0xff] (!%p150_p2) }
   0xc   : > { %v284_v27 = vld [vmem:[%s1410_s2 + $0xe8] sm:$0xff] (!%p150_p2) }
   0xd   : > { %s1413_s16 = smov (!%p179_p3, %s909_s16), 31  ;;  %1025 = vmatpush3.bf16.msra.mxu1 %v267_v10  ;;  %v272_v10 = vpack.c.bf16 %v263_v9, %v262_v8 }
   0xe   : > { %s1190_s4 = sshll.u32 %s1413_s16, 3  ;;  %1026 = vmatprep.subr.bf16.mxu1 %v268_v13 }
   0xf   : > { %s1197_s7 = scalar_lea.vmem %s1409_s1, %s1190_s4  ;;  %s1241_s23 = scalar_lea.vmem %s1408_s0, %s1190_s4 }
  0x10   : > { %v221_v16 = vld [vmem:[%s1197_s7] sm:$0xff]  ;;  %v222_v17 = vld [vmem:[%s1197_s7 + $0x8] sm:$0xff]  ;;  %v223_v18 = vld [vmem:[%s1197_s7 + $0x10] sm:$0xff]  ;;  %s1387_s22 = scalar_lea.vmem %s1411_s3, %s1190_s4 }
  0x11   : > { %v237_v19 = vpack.c.bf16 %v222_v17, %v221_v16  ;;  %v224_v20 = vld [vmem:[%s1197_s7 + $0x18] sm:$0xff]  ;;  %v225_v21 = vld [vmem:[%s1197_s7 + $0x20] sm:$0xff]  ;;  %v226_v22 = vld [vmem:[%s1197_s7 + $0x28] sm:$0xff]  ;;  %1027 = vmatpush3.bf16.msra.mxu1 %v268_v13  ;;  %v273_v13 = vpack.c.bf16 %v265_v12, %v264_v11  ;;  %v291_v17 = vpack.c.bf16 %v276_v15, %v275_v14 }
  0x12   : > { %v238_v23 = vpack.c.bf16 %v224_v20, %v223_v18  ;;  %v239_v25 = vpack.c.bf16 %v226_v22, %v225_v21  ;;  %v227_v29 = vld [vmem:[%s1197_s7 + $0x30] sm:$0xff]  ;;  %v228_v30 = vld [vmem:[%s1197_s7 + $0x38] sm:$0xff]  ;;  %v229_v31 = vld [vmem:[%s1197_s7 + $0x40] sm:$0xff]  ;;  %1028 = vmatprep.subr.bf16.mxu1 %v269_v26 }
  0x13   : > { %988 = vmatprep.mubr.msk.bf16.mxu0 %vm300_vm1, %v237_v19  ;;  %v230_v32 = vld [vmem:[%s1197_s7 + $0x48] sm:$0xff]  ;;  %v240_v34 = vpack.c.bf16 %v228_v30, %v227_v29  ;;  %v231_v39 = vld [vmem:[%s1197_s7 + $0x50] sm:$0xff]  ;;  %v232_v40 = vld [vmem:[%s1197_s7 + $0x58] sm:$0xff] }
  0x14   : > { %989 = vmatmul.mubr.msk.bf16.vlgmr.msra.gmra.mrb[0].mxu0 %vm300_vm1, %v238_v23  ;;  %v241_v37 = vpack.c.bf16 %v230_v32, %v229_v31  ;;  %v233_v41 = vld [vmem:[%s1197_s7 + $0x60] sm:$0xff]  ;;  %v234_v42 = vld [vmem:[%s1197_s7 + $0x68] sm:$0xff]  ;;  %v242_v43 = vpack.c.bf16 %v232_v40, %v231_v39  ;;  %v235_v45 = vld [vmem:[%s1197_s7 + $0x70] sm:$0xff] }
  0x15   : > { %1005 = vmatpush3.bf16.msra.mxu0 %v451_v24  ;;  %992 = vmatprep.mubr.msk.bf16.mxu0 %vm300_vm1, %v239_v25  ;;  %v243_v44 = vpack.c.bf16 %v234_v42, %v233_v41  ;;  %v236_v46 = vld [vmem:[%s1197_s7 + $0x78] sm:$0xff]  ;;  %v197_v47 = vld [vmem:[%s1241_s23] sm:$0xff]  ;;  %v198_v48 = vld [vmem:[%s1241_s23 + $0x8] sm:$0xff] }
  0x16   : > { %1029 = vmatpush3.bf16.msra.mxu1 %v269_v26  ;;  %v244_v49 = vpack.c.bf16 %v236_v46, %v235_v45  ;;  %v213_v50 = vpack.c.bf16 %v198_v48, %v197_v47  ;;  %v199_v51 = vld [vmem:[%s1241_s23 + $0x10] sm:$0xff]  ;;  %v200_v52 = vld [vmem:[%s1241_s23 + $0x18] sm:$0xff]  ;;  %v201_v53 = vld [vmem:[%s1241_s23 + $0x20] sm:$0xff]  ;;  %1054 = vmatprep.subr.bf16.mxu0 %v291_v17 }
  0x17   : > { %1030 = vmatprep.subr.bf16.mxu1 %v270_v33  ;;  %v202_v54 = vld [vmem:[%s1241_s23 + $0x28] sm:$0xff]  ;;  %v214_v55 = vpack.c.bf16 %v200_v52, %v199_v51  ;;  %v203_v57 = vld [vmem:[%s1241_s23 + $0x30] sm:$0xff]  ;;  %v204_v58 = vld [vmem:[%s1241_s23 + $0x38] sm:$0xff] }
  0x18   : > { %v215_v56 = vpack.c.bf16 %v202_v54, %v201_v53  ;;  %v205_v59 = vld [vmem:[%s1241_s23 + $0x40] sm:$0xff]  ;;  %v206_v60 = vld [vmem:[%s1241_s23 + $0x48] sm:$0xff]  ;;  %v216_v61 = vpack.c.bf16 %v204_v58, %v203_v57  ;;  %v207_v63 = vld [vmem:[%s1241_s23 + $0x50] sm:$0xff] }
  0x19   : > { %v217_v62 = vpack.c.bf16 %v206_v60, %v205_v59  ;;  %v208_v0 = vld [vmem:[%s1241_s23 + $0x58] sm:$0xff]  ;;  %v209_v1 = vld [vmem:[%s1241_s23 + $0x60] sm:$0xff]  ;;  %v210_v2 = vld [vmem:[%s1241_s23 + $0x68] sm:$0xff] }
  0x1a   : > { %1031 = vmatpush3.bf16.msra.mxu1 %v270_v33  ;;  %v218_v3 = vpack.c.bf16 %v208_v0, %v207_v63  ;;  %v219_v4 = vpack.c.bf16 %v210_v2, %v209_v1  ;;  %v211_v5 = vld [vmem:[%s1241_s23 + $0x70] sm:$0xff]  ;;  %v212_v6 = vld [vmem:[%s1241_s23 + $0x78] sm:$0xff]  ;;  %v279_v20 = vld [vmem:[%s1410_s2 + $0xc0] sm:$0xff] }
  0x1b   : > { %1032 = vmatprep.subr.bf16.mxu1 %v271_v38  ;;  %v220_v7 = vpack.c.bf16 %v212_v6, %v211_v5  ;;  %v277_v16 = vld [vmem:[%s1410_s2 + $0xb0] sm:$0xff]  ;;  %v278_v18 = vld [vmem:[%s1410_s2 + $0xb8] sm:$0xff]  ;;  %v280_v21 = vld [vmem:[%s1410_s2 + $0xc8] sm:$0xff] }
  0x1c   : > { %993 = vmatmul.mubr.msk.bf16.gmra.mrb[4].mxu0 %vm300_vm1, %v240_v34  ;;  %v292_v19 = vpack.c.bf16 %v278_v18, %v277_v16  ;;  %v1302_v22 = vpack.c.bf16 %v280_v21, %v279_v20  ;;  %v281_v23 = vld [vmem:[%s1410_s2 + $0xd0] sm:$0xff]  ;;  %v282_v24 = vld [vmem:[%s1410_s2 + $0xd8] sm:$0xff]  ;;  %v283_v26 = vld [vmem:[%s1410_s2 + $0xe0] sm:$0xff] }
  0x1d   : > { %996 = vmatprep.mubr.msk.bf16.mxu0 %vm300_vm1, %v241_v37  ;;  %v1311_v25 = vpack.c.bf16 %v282_v24, %v281_v23  ;;  %v1321_v28 = vpack.c.bf16 %v284_v27, %v283_v26  ;;  %v285_v29 = vld [vmem:[%s1410_s2 + $0xf0] sm:$0xff]  ;;  %v286_v30 = vld [vmem:[%s1410_s2 + $0xf8] sm:$0xff]  ;;  %v288_v26 = vld [vmem:[%s1410_s2 + $0x108] sm:$0xff] }
  0x1e   : > { %1033 = vmatpush3.bf16.msra.mxu1 %v271_v38  ;;  %v1331_v31 = vpack.c.bf16 %v286_v30, %v285_v29  ;;  %v1339_v32 = vld [vmem:[%s1410_s2 + $0x10] ss:$0 sm:$0xff]  ;;  %v290_v29 = vld [vmem:[%s1410_s2 + $0x118] sm:$0xff] }
  0x1f   : > { %1034 = vmatprep.subr.bf16.mxu1 %v272_v10 }
  0x22   : > { %1035 = vmatpush3.bf16.msra.mxu1 %v272_v10 }
  0x23   : > { %1036 = vmatprep.subr.bf16.mxu1 %v273_v13 }
  0x24   : > { %997 = vmatmul.mubr.msk.bf16.gmra.mrb[8].mxu0 %vm300_vm1, %v242_v43 }
  0x25   : > { %1000 = vmatprep.mubr.msk.bf16.mxu0 %vm300_vm1, %v243_v44 }
  0x26   : > { %1037 = vmatpush3.bf16.msra.mxu1 %v273_v13 }
  0x27   : > { %1086 = vmatprep.subr.bf16.mxu1 %v291_v17 }
  0x2c   : > { %1001 = vmatmul.mubr.msk.bf16.gmra.mrb[12].mxu0 %vm300_vm1, %v244_v49 }
  0x2d   : > { %1006 = vmatprep.mubr.msk.bf16.mxu0 %vm300_vm1, %v213_v50 }
  0x34   : > { %1007 = vmatmul.mubr.msk.bf16.vlgmr.msra.gmra.mrb[0].mxu0 %vm300_vm1, %v214_v55 }
  0x35   : > { %1010 = vmatprep.mubr.msk.bf16.mxu0 %vm300_vm1, %v215_v56  ;;  %1055 = vmatpush3.bf16.msra.mxu0 %v291_v17 }
  0x36   : > { %1056 = vmatprep.subr.bf16.mxu0 %v292_v19 }
  0x39   : > { %1057 = vmatpush3.bf16.msra.mxu0 %v292_v19 }
  0x3a   : > { %1058 = vmatprep.subr.bf16.mxu0 %v1302_v22 }
  0x3c   : > { %1011 = vmatmul.mubr.msk.bf16.gmra.mrb[4].mxu0 %vm300_vm1, %v216_v61 }
  0x3d   : > { %1014 = vmatprep.mubr.msk.bf16.mxu0 %vm300_vm1, %v217_v62  ;;  %1059 = vmatpush3.bf16.msra.mxu0 %v1302_v22 }
  0x3e   : > { %1060 = vmatprep.subr.bf16.mxu0 %v1311_v25 }
  0x41   : > { %1061 = vmatpush3.bf16.msra.mxu0 %v1311_v25 }
  0x42   : > { %1062 = vmatprep.subr.bf16.mxu0 %v1321_v28 }
  0x44   : > { %1015 = vmatmul.mubr.msk.bf16.gmra.mrb[8].mxu0 %vm300_vm1, %v218_v3 }
  0x45   : > { %1018 = vmatprep.mubr.msk.bf16.mxu0 %vm300_vm1, %v219_v4  ;;  %1063 = vmatpush3.bf16.msra.mxu0 %v1321_v28 }
  0x46   : > { %1064 = vmatprep.subr.bf16.mxu0 %v1331_v31 }
  0x49   : > { %1065 = vmatpush3.bf16.msra.mxu0 %v1331_v31 }
  0x4c   : > { %1019 = vmatmul.mubr.msk.bf16.gmra.mrb[12].mxu0 %vm300_vm1, %v220_v7 }
 0x107   : > { %v1008_v33 = vpop.f32.mrb[0].mxu0 }
 0x108   : > { %v556_v34 = vadd.f32 %v1008_v33, %v1339_v32  ;;  %v487_v35 = vpop.f32.mrb[1].mxu0 }
 0x109   : > { %v554_v36 = vadd.f32 %v1339_v32, %v487_v35  ;;  %v1009_v37 = vpop.f32.mrb[2].mxu0 }
 0x10a   : > { %v557_v38 = vadd.f32 %v1009_v37, %v1339_v32  ;;  %v490_v39 = vpop.f32.mrb[3].mxu0  ;;  %v572_v41 = vmax.f32 %v556_v34, 0.0 }
 0x10b   : > { %v555_v40 = vadd.f32 %v1339_v32, %v490_v39  ;;  %v570_v43 = vmax.f32 %v554_v36, 0.0 }
 0x10c   : > { %v573_v42 = vmax.f32 %v557_v38, 0.0 }
 0x10d   : > { %v571_v44 = vmax.f32 %v555_v40, 0.0 }
 0x10e   : > { %v587_v45 = vpack.c.bf16 %v573_v42, %v572_v41 }
 0x10f   : > { %v1012_v46 = vpop.f32.mrb[4].mxu0  ;;  %v586_v47 = vpack.c.bf16 %v571_v44, %v570_v43 }
 0x110   : > { %v560_v48 = vadd.f32 %v1012_v46, %v1339_v32  ;;  %v503_v49 = vpop.f32.mrb[5].mxu0 }
 0x111   : > { %v558_v50 = vadd.f32 %v1339_v32, %v503_v49  ;;  %v1013_v51 = vpop.f32.mrb[6].mxu0  ;;  %1038 = vmatprep.mubr.bf16.mxu1 %v586_v47 }
 0x112   : > { %v561_v52 = vadd.f32 %v1013_v51, %v1339_v32  ;;  %v506_v53 = vpop.f32.mrb[7].mxu0  ;;  %1039 = vmatmul.mubr.bf16.vlgmr.msra.gmra.mrb[0].mxu1 %v587_v45  ;;  %v576_v55 = vmax.f32 %v560_v48, 0.0 }
 0x113   : > { %v559_v54 = vadd.f32 %v1339_v32, %v506_v53  ;;  %1094 = vmatpush3.bf16.msra.mxu1 %v291_v17  ;;  %v574_v57 = vmax.f32 %v558_v50, 0.0 }
 0x114   : > { %v577_v56 = vmax.f32 %v561_v52, 0.0  ;;  %1087 = vmatprep.subr.bf16.mxu1 %v292_v19 }
 0x115   : > { %v575_v58 = vmax.f32 %v559_v54, 0.0 }
 0x116   : > { %v589_v59 = vpack.c.bf16 %v577_v56, %v576_v55 }
 0x117   : > { %v588_v60 = vpack.c.bf16 %v575_v58, %v574_v57  ;;  %v1016_v61 = vpop.f32.mrb[8].mxu0  ;;  %1095 = vmatpush3.bf16.msra.mxu1 %v292_v19 }
 0x118   : > { %v564_v62 = vadd.f32 %v1016_v61, %v1339_v32  ;;  %v519_v63 = vpop.f32.mrb[9].mxu0  ;;  %1088 = vmatprep.subr.bf16.mxu1 %v1302_v22 }
 0x119   : > { %v562_v0 = vadd.f32 %v1339_v32, %v519_v63  ;;  %v1017_v1 = vpop.f32.mrb[10].mxu0  ;;  %1042 = vmatprep.mubr.bf16.mxu1 %v588_v60 }
 0x11a   : > { %v565_v2 = vadd.f32 %v1017_v1, %v1339_v32  ;;  %v522_v3 = vpop.f32.mrb[11].mxu0  ;;  %1043 = vmatmul.mubr.bf16.gmra.mrb[4].mxu1 %v589_v59  ;;  %v580_v5 = vmax.f32 %v564_v62, 0.0 }
 0x11b   : > { %v563_v4 = vadd.f32 %v1339_v32, %v522_v3  ;;  %1096 = vmatpush3.bf16.msra.mxu1 %v1302_v22  ;;  %v578_v7 = vmax.f32 %v562_v0, 0.0 }
 0x11c   : > { %v581_v6 = vmax.f32 %v565_v2, 0.0  ;;  %1089 = vmatprep.subr.bf16.mxu1 %v1311_v25 }
 0x11d   : > { %v579_v8 = vmax.f32 %v563_v4, 0.0 }
 0x11e   : > { %v591_v9 = vpack.c.bf16 %v581_v6, %v580_v5 }
 0x11f   : > { %v590_v10 = vpack.c.bf16 %v579_v8, %v578_v7  ;;  %v1020_v11 = vpop.f32.mrb[12].mxu0  ;;  %1097 = vmatpush3.bf16.msra.mxu1 %v1311_v25  ;;  %v287_v25 = vld [vmem:[%s1410_s2 + $0x100] sm:$0xff] }
 0x120   : > { %v568_v12 = vadd.f32 %v1020_v11, %v1339_v32  ;;  %v535_v13 = vpop.f32.mrb[13].mxu0  ;;  %1090 = vmatprep.subr.bf16.mxu1 %v1321_v28  ;;  %v297_v27 = vpack.c.bf16 %v288_v26, %v287_v25 }
 0x121   : > { %v566_v14 = vadd.f32 %v1339_v32, %v535_v13  ;;  %v1021_v15 = vpop.f32.mrb[14].mxu0  ;;  %1046 = vmatprep.mubr.bf16.mxu1 %v590_v10 }
 0x122   : > { %v569_v16 = vadd.f32 %v1021_v15, %v1339_v32  ;;  %v538_v17 = vpop.f32.mrb[15].mxu0  ;;  %1047 = vmatmul.mubr.bf16.gmra.mrb[8].mxu1 %v591_v9  ;;  %v584_v19 = vmax.f32 %v568_v12, 0.0  ;;  %1066 = vmatprep.subr.bf16.mxu0 %v297_v27 }
 0x123   : > { %v567_v18 = vadd.f32 %v1339_v32, %v538_v17  ;;  %1098 = vmatpush3.bf16.msra.mxu1 %v1321_v28  ;;  %v582_v21 = vmax.f32 %v566_v14, 0.0  ;;  %1067 = vmatpush3.bf16.msra.mxu0 %v297_v27  ;;  %v289_v28 = vld [vmem:[%s1410_s2 + $0x110] sm:$0xff] }
 0x124   : > { %v585_v20 = vmax.f32 %v569_v16, 0.0  ;;  %1091 = vmatprep.subr.bf16.mxu1 %v1331_v31  ;;  %v298_v30 = vpack.c.bf16 %v290_v29, %v289_v28 }
 0x125   : > { %v583_v22 = vmax.f32 %v567_v18, 0.0 }
 0x126   : > { %v593_v23 = vpack.c.bf16 %v585_v20, %v584_v19  ;;  %1068 = vmatprep.subr.bf16.mxu0 %v298_v30 }
 0x127   : > { %v592_v24 = vpack.c.bf16 %v583_v22, %v582_v21  ;;  %1099 = vmatpush3.bf16.msra.mxu1 %v1331_v31  ;;  %1069 = vmatpush3.bf16.msra.mxu0 %v298_v30  ;;  %v932_v31 = vld [vmem:[%s1410_s2 + $0x98] ss:$0 sm:$0xff] }
 0x128   : > { %1092 = vmatprep.subr.bf16.mxu1 %v297_v27 }
 0x129   : > { %1050 = vmatprep.mubr.bf16.mxu1 %v592_v24  ;;  %v933_v24 = vld [vmem:[%s1410_s2 + $0x120] ss:$0 sm:$0xff] }
 0x12a   : > { %1051 = vmatmul.mubr.bf16.gmra.mrb[12].mxu1 %v593_v23 }
 0x12b   : > { %1100 = vmatpush3.bf16.msra.mxu1 %v297_v27 }
 0x12c   : > { %1093 = vmatprep.subr.bf16.mxu1 %v298_v30 }
 0x12f   : > { %1101 = vmatpush3.bf16.msra.mxu1 %v298_v30 }
 0x1e5   : > { %v1040_v32 = vpop.f32.mrb[0].mxu1 }
 0x1e6   : > { %v641_v33 = vadd.f32 %v1040_v32, %v932_v31  ;;  %v632_v34 = vpop.f32.mrb[1].mxu1 }
 0x1e7   : > { %v633_v35 = vadd.f32 %v932_v31, %v632_v34  ;;  %v1041_v36 = vpop.f32.mrb[2].mxu1 }
 0x1e8   : > { %v644_v37 = vadd.f32 %v1041_v36, %v932_v31  ;;  %v635_v38 = vpop.f32.mrb[3].mxu1  ;;  %v697_v40 = vmax.f32 %v641_v33, 0.0 }
 0x1e9   : > { %v636_v39 = vadd.f32 %v932_v31, %v635_v38  ;;  %v695_v42 = vmax.f32 %v633_v35, 0.0 }
 0x1ea   : > { %v698_v41 = vmax.f32 %v644_v37, 0.0 }
 0x1eb   : > { %v696_v43 = vmax.f32 %v636_v39, 0.0 }
 0x1ec   : > { %v712_v44 = vpack.c.bf16 %v698_v41, %v697_v40 }
 0x1ed   : > { %v711_v45 = vpack.c.bf16 %v696_v43, %v695_v42  ;;  %v1044_v46 = vpop.f32.mrb[4].mxu1 }
 0x1ee   : > { %v657_v47 = vadd.f32 %v1044_v46, %v932_v31  ;;  %v648_v48 = vpop.f32.mrb[5].mxu1 }
 0x1ef   : > { %v649_v49 = vadd.f32 %v932_v31, %v648_v48  ;;  %v1045_v50 = vpop.f32.mrb[6].mxu1  ;;  %1070 = vmatprep.mubr.bf16.mxu0 %v711_v45 }
 0x1f0   : > { %v660_v51 = vadd.f32 %v1045_v50, %v932_v31  ;;  %v651_v52 = vpop.f32.mrb[7].mxu1  ;;  %1071 = vmatmul.mubr.bf16.vlgmr.msra.gmra.mrb[16].mxu0 %v712_v44  ;;  %v701_v54 = vmax.f32 %v657_v47, 0.0 }
 0x1f1   : > { %v652_v53 = vadd.f32 %v932_v31, %v651_v52  ;;  %v699_v56 = vmax.f32 %v649_v49, 0.0 }
 0x1f2   : > { %v702_v55 = vmax.f32 %v660_v51, 0.0 }
 0x1f3   : > { %v700_v57 = vmax.f32 %v652_v53, 0.0 }
 0x1f4   : > { %v714_v58 = vpack.c.bf16 %v702_v55, %v701_v54 }
 0x1f5   : > { %v713_v59 = vpack.c.bf16 %v700_v57, %v699_v56  ;;  %v1048_v60 = vpop.f32.mrb[8].mxu1 }
 0x1f6   : > { %v673_v61 = vadd.f32 %v1048_v60, %v932_v31  ;;  %v664_v62 = vpop.f32.mrb[9].mxu1 }
 0x1f7   : > { %v665_v63 = vadd.f32 %v932_v31, %v664_v62  ;;  %v1049_v0 = vpop.f32.mrb[10].mxu1  ;;  %1074 = vmatprep.mubr.bf16.mxu1 %v713_v59 }
 0x1f8   : > { %v676_v1 = vadd.f32 %v1049_v0, %v932_v31  ;;  %v667_v2 = vpop.f32.mrb[11].mxu1  ;;  %1075 = vmatmul.mubr.bf16.vlgmr.msra.gmra.mrb[16].mxu1 %v714_v58  ;;  %v705_v4 = vmax.f32 %v673_v61, 0.0 }
 0x1f9   : > { %v668_v3 = vadd.f32 %v932_v31, %v667_v2  ;;  %v703_v6 = vmax.f32 %v665_v63, 0.0 }
 0x1fa   : > { %v706_v5 = vmax.f32 %v676_v1, 0.0 }
 0x1fb   : > { %v704_v7 = vmax.f32 %v668_v3, 0.0 }
 0x1fc   : > { %v716_v8 = vpack.c.bf16 %v706_v5, %v705_v4 }
 0x1fd   : > { %v715_v9 = vpack.c.bf16 %v704_v7, %v703_v6  ;;  %v1052_v10 = vpop.f32.mrb[12].mxu1 }
 0x1fe   : > { %v689_v11 = vadd.f32 %v1052_v10, %v932_v31  ;;  %v680_v12 = vpop.f32.mrb[13].mxu1 }
 0x1ff   : > { %v681_v13 = vadd.f32 %v932_v31, %v680_v12  ;;  %v1053_v14 = vpop.f32.mrb[14].mxu1  ;;  %1078 = vmatprep.mubr.bf16.mxu1 %v715_v9 }
 0x200   : > { %v692_v15 = vadd.f32 %v1053_v14, %v932_v31  ;;  %v683_v16 = vpop.f32.mrb[15].mxu1  ;;  %1079 = vmatmul.mubr.bf16.gmra.mrb[20].mxu1 %v716_v8  ;;  %v709_v18 = vmax.f32 %v689_v11, 0.0 }
 0x201   : > { %v684_v17 = vadd.f32 %v932_v31, %v683_v16  ;;  %v707_v20 = vmax.f32 %v681_v13, 0.0 }
 0x202   : > { %v710_v19 = vmax.f32 %v692_v15, 0.0 }
 0x203   : > { %v708_v21 = vmax.f32 %v684_v17, 0.0 }
 0x204   : > { %v718_v22 = vpack.c.bf16 %v710_v19, %v709_v18 }
 0x205   : > { %v717_v23 = vpack.c.bf16 %v708_v21, %v707_v20 }
 0x207   : > { %1082 = vmatprep.mubr.bf16.mxu1 %v717_v23 }
 0x208   : > { %1083 = vmatmul.mubr.bf16.gmra.mrb[24].mxu1 %v718_v22 }
 0x2c3   : > { %v1072_v25 = vpop.f32.mrb[16].mxu0 }
 0x2c4   : > { %v766_v26 = vadd.f32 %v1072_v25, %v933_v24  ;;  %v757_v27 = vpop.f32.mrb[17].mxu0 }
 0x2c5   : > { %v758_v28 = vadd.f32 %v933_v24, %v757_v27  ;;  %v1073_v29 = vpop.f32.mrb[18].mxu0 }
 0x2c6   : > { %822 = vst [vmem:[%s1387_s22 + $0x10] sm:$0xff] %v766_v26  ;;  %v769_v30 = vadd.f32 %v1073_v29, %v933_v24  ;;  %v760_v31 = vpop.f32.mrb[19].mxu0 }
 0x2c7   : > { %820 = vst [vmem:[%s1387_s22] sm:$0xff] %v758_v28  ;;  %v761_v32 = vadd.f32 %v933_v24, %v760_v31 }
 0x2c8   : > { %823 = vst [vmem:[%s1387_s22 + $0x18] sm:$0xff] %v769_v30 }
 0x2c9   : > { %821 = vst [vmem:[%s1387_s22 + $0x8] sm:$0xff] %v761_v32 }
 0x2cb   : > { %v1076_v33 = vpop.f32.mrb[16].mxu1 }
 0x2cc   : > { %v782_v34 = vadd.f32 %v1076_v33, %v933_v24  ;;  %v773_v35 = vpop.f32.mrb[17].mxu1 }
 0x2cd   : > { %v774_v36 = vadd.f32 %v933_v24, %v773_v35  ;;  %v1077_v37 = vpop.f32.mrb[18].mxu1 }
 0x2ce   : > { %826 = vst [vmem:[%s1387_s22 + $0x30] sm:$0xff] %v782_v34  ;;  %v785_v38 = vadd.f32 %v1077_v37, %v933_v24  ;;  %v776_v39 = vpop.f32.mrb[19].mxu1 }
 0x2cf   : > { %824 = vst [vmem:[%s1387_s22 + $0x20] sm:$0xff] %v774_v36  ;;  %v777_v40 = vadd.f32 %v933_v24, %v776_v39 }
 0x2d0   : > { %827 = vst [vmem:[%s1387_s22 + $0x38] sm:$0xff] %v785_v38 }
 0x2d1   : > { %825 = vst [vmem:[%s1387_s22 + $0x28] sm:$0xff] %v777_v40 }
 0x2d3   : > { %v1080_v41 = vpop.f32.mrb[20].mxu1 }
 0x2d4   : > { %v798_v42 = vadd.f32 %v1080_v41, %v933_v24  ;;  %v789_v43 = vpop.f32.mrb[21].mxu1 }
 0x2d5   : > { %v790_v44 = vadd.f32 %v933_v24, %v789_v43  ;;  %v1081_v45 = vpop.f32.mrb[22].mxu1 }
 0x2d6   : > { %830 = vst [vmem:[%s1387_s22 + $0x50] sm:$0xff] %v798_v42  ;;  %v801_v46 = vadd.f32 %v1081_v45, %v933_v24  ;;  %v792_v47 = vpop.f32.mrb[23].mxu1 }
 0x2d7   : > { %828 = vst [vmem:[%s1387_s22 + $0x40] sm:$0xff] %v790_v44  ;;  %v793_v48 = vadd.f32 %v933_v24, %v792_v47 }
 0x2d8   : > { %831 = vst [vmem:[%s1387_s22 + $0x58] sm:$0xff] %v801_v46 }
 0x2d9   : > { %829 = vst [vmem:[%s1387_s22 + $0x48] sm:$0xff] %v793_v48 }
 0x2db   : > { %v1084_v49 = vpop.f32.mrb[24].mxu1 }
 0x2dc   : > { %v814_v50 = vadd.f32 %v1084_v49, %v933_v24  ;;  %v805_v51 = vpop.f32.mrb[25].mxu1 }
 0x2dd   : > { %v806_v52 = vadd.f32 %v933_v24, %v805_v51  ;;  %v1085_v53 = vpop.f32.mrb[26].mxu1 }
 0x2de   : > { %834 = vst [vmem:[%s1387_s22 + $0x70] sm:$0xff] %v814_v50  ;;  %v817_v54 = vadd.f32 %v1085_v53, %v933_v24  ;;  %v808_v55 = vpop.f32.mrb[27].mxu1 }
 0x2df   : > { %832 = vst [vmem:[%s1387_s22 + $0x60] sm:$0xff] %v806_v52  ;;  %v809_v56 = vadd.f32 %v933_v24, %v808_v55 }
 0x2e0   : > { %835 = vst [vmem:[%s1387_s22 + $0x78] sm:$0xff] %v817_v54 }
 0x2e1   : > { %833 = vst [vmem:[%s1387_s22 + $0x68] sm:$0xff] %v809_v56 }
 0x2e2 PF: > { %s13_s12 = sadd.s32 1, %s1134_s12  }
 0x2e3   : > { %p10_p4 = scmp.ge.s32.totalorder %s13_s12, 4  }
 0x2e5   :  { %12 = sbr.rel (!%p10_p4) target bundleno = 1 (0x1), region = 65 }

</bundles_post_ra>
